<compile_context>
chip_gen: v5e
topology: v5e:2x2
jax: 0.10.0
libtpu: 0.0.40
codegen_flags: <defaults>
</compile_context>

<pallas_src>
import functools

import numpy as np
import jax
import jax.numpy as jnp
from jax import lax
from jax.experimental import pallas as pl
from jax.experimental.pallas import tpu as pltpu


_PANEL_COLS = 128           # output-column panel width for the banded MXU matmul
_MIN_BLOCK_BYTES = 512 * 1024


def _vmem_capacity_bytes():
    try:
        return int(pltpu.get_tpu_info().vmem_capacity_bytes)
    except Exception:
        return 64 * 1024 * 1024      # conservative fallback (v7x per-TensorCore VMEM)


_VMEM_CAPACITY = _vmem_capacity_bytes()
_VMEM_LIMIT_BYTES = (_VMEM_CAPACITY * 3) // 4    # scoped limit handed to Mosaic
_VMEM_BUDGET_BYTES = _VMEM_CAPACITY // 2         # what the tiler plans against


def _separable_taps(filter_kernel, gain):
    """1-D taps (kv, kh) with outer(kv, kh) == normalized 2-D FIR kernel * gain."""
    f = np.asarray(filter_kernel, dtype=np.float64).reshape(-1)
    if f.size != 4:
        raise NotImplementedError(
            "this Pallas kernel implements the default 4-tap FIR filter; "
            f"got {f.size} taps")
    s = float(f.sum())
    kh = tuple(float(v) / s for v in f)                # horizontal taps
    kv = tuple(float(v) / s * float(gain) for v in f)  # vertical taps carry the gain
    return kv, kh


def _hmat(kh, W):
    """Banded (W, W/2) matrix: column o sums input columns 2o-1 .. 2o+2 with kh."""
    Wo = W // 2
    m = np.zeros((W, Wo), np.float64)
    for o in range(Wo):
        for s, tap in enumerate(kh):
            w = 2 * o - 1 + s
            if 0 <= w < W:
                m[w, o] = tap
    return m


def _divisors_desc(n):
    return [d for d in range(n, 0, -1) if n % d == 0]


def _vmem_bytes(cb, hb, W, in_bytes, out_bytes, c_bytes, row_tiled):
    Wo = W // 2
    main_in = 2 * cb * hb * (2 * W) * in_bytes                    # double-buffered input
    halo = (2 * 2 * cb * 8 * (2 * W) * in_bytes) if row_tiled else 0
    outp = 2 * cb * hb * Wo * out_bytes                           # double-buffered output
    hmat = 2 * W * Wo * c_bytes                                   # resident tap matrix
    scratch = cb * hb * W * c_bytes                               # v_ref
    temps = cb * hb * (2 * W + 2 * Wo) * max(c_bytes, 4)          # xe/xo + matmul in/out
    return main_in + halo + outp + hmat + scratch + temps


def _choose_tiling(NC, Ho, W, in_bytes, out_bytes, c_bytes, budget,
                   channel_block=None, row_block=None):
    """Pick (Cb, Hb): channels and output rows per grid step."""
    if channel_block is not None and NC % channel_block:
        raise ValueError("channel_block must divide N*C")
    if row_block is not None and (Ho % row_block or (row_block != Ho and row_block % 8)):
        raise ValueError("row_block must divide H/2 and be a multiple of 8")

    def fits(cb, hb):
        return _vmem_bytes(cb, hb, W, in_bytes, out_bytes, c_bytes, hb < Ho) <= budget

    cb_list = [channel_block] if channel_block is not None else _divisors_desc(NC)
    hb_list = ([row_block] if row_block is not None
               else [Ho] + [d for d in _divisors_desc(Ho) if d < Ho and d % 8 == 0])

    chosen = None
    for hb in hb_list:                 # whole-image rows first (no halo traffic) ...
        for cb in cb_list:             # ... with the biggest channel block that fits
            if fits(cb, hb):
                chosen = (cb, hb)
                break
        if chosen is not None:
            break
    if chosen is None:
        # TODO(synk): add lane (W) tiling for images whose single-row-block working
        # set still exceeds VMEM.
        raise NotImplementedError("spatial working set too large for VMEM")
    cb, hb = chosen

    if channel_block is None and row_block is None:
        # Prefer >= 4 grid steps (2 TensorCores x double buffering) as long as each
        # block keeps >= _MIN_BLOCK_BYTES of input so the ~0.35us/step cost stays hidden.
        if (NC // cb) * (Ho // hb) < 4:
            for hb2 in hb_list:
                for cb2 in cb_list:
                    steps = (NC // cb2) * (Ho // hb2)
                    if (steps >= 4
                            and cb2 * hb2 * 2 * W * in_bytes >= _MIN_BLOCK_BYTES
                            and fits(cb2, hb2)):
                        return cb2, hb2
    return cb, hb


def _make_kernel(kv, W, Wo, cb, hb, n_r, compute_dtype, precision, row_tiled):
    kv0, kv1, kv2, kv3 = kv

    def dot(lhs, rhs):
        return lax.dot_general(lhs, rhs,
                               dimension_numbers=(((1,), (0,)), ((), ())),
                               preferred_element_type=jnp.float32,
                               precision=precision)

    def kernel(*refs):
        if row_tiled:
            x_ref, prev_ref, next_ref, hm_ref, o_ref, v_ref = refs
        else:
            x_ref, hm_ref, o_ref, v_ref = refs

        # View row k holds [x[2k, :], x[2k+1, :]] side by side along lanes.
        xe = x_ref[:, :, :W].astype(compute_dtype)    # input rows 2k
        xo = x_ref[:, :, W:].astype(compute_dtype)    # input rows 2k+1

        # Vertical 4-tap FIR at stride 2 (gain folded into kv):
        #   v[k] = kv0*x[2k-1] + kv1*x[2k] + kv2*x[2k+1] + kv3*x[2k+2]
        # The +-1-row terms land through offset ref-slice adds; image borders
        # (zero padding) come out naturally because those slices stop one row short.
        v_ref[...] = kv1 * xe + kv2 * xo
        v_ref[:, 1:, :] += kv0 * xo[:, :-1, :]
        v_ref[:, :-1, :] += kv3 * xe[:, 1:, :]

        if row_tiled:
            ri = pl.program_id(1)

            @pl.when(ri > 0)
            def _():   # halo: x[2*k0 - 1] == odd half of the view row just above this block
                v_ref[:, 0:1, :] += kv0 * prev_ref[:, 7:8, W:].astype(compute_dtype)

            @pl.when(ri < n_r - 1)
            def _():   # halo: x[2*(k0+hb-1) + 2] == even half of the view row just below
                v_ref[:, hb - 1:hb, :] += kv3 * next_ref[:, 0:1, :W].astype(compute_dtype)

        # Horizontal 4-tap FIR at stride 2 on the MXU: contract W against the banded
        # (W, Wo) tap matrix.  Panel-blocked along output columns for wide images so
        # the dense-matmul work stays bounded by the 4-tap band.
        # TODO(synk): on v5e with f32 activations and very large W, casting this
        # matmul to bf16 taps would trade ~1e-3 accuracy for the remaining MXU time.
        v2 = v_ref[...].reshape(cb * hb, W)
        if Wo <= _PANEL_COLS:
            o_ref[...] = dot(v2, hm_ref[...]).reshape(cb, hb, Wo).astype(o_ref.dtype)
        else:
            for p0 in range(0, Wo, _PANEL_COLS):
                p1 = min(p0 + _PANEL_COLS, Wo)
                w0 = max(2 * p0 - 1, 0)
                w1 = min(2 * p1 + 1, W)
                blk = dot(v2[:, w0:w1], hm_ref[w0:w1, p0:p1])
                o_ref[:, :, p0:p1] = blk.reshape(cb, hb, p1 - p0).astype(o_ref.dtype)

    return kernel


@functools.partial(jax.jit,
                   static_argnames=("filter", "gain", "channel_block", "row_block"))
def downsample_fir(x, filter=(1, 3, 3, 1), gain=1.0,
                   channel_block=None, row_block=None):
    """Pallas TPU implementation of Downsample(mode='FIR').forward for NCHW input."""
    N, C, H, W = x.shape
    if H % 2 or W % 2 or H < 4 or W < 4:
        raise NotImplementedError("H and W must be even and >= 4")
    Ho, Wo = H // 2, W // 2
    NC = N * C
    kv, kh = _separable_taps(filter, gain)

    out_dtype = x.dtype
    compute_dtype = jnp.bfloat16 if x.dtype == jnp.bfloat16 else jnp.float32
    c_bytes = jnp.dtype(compute_dtype).itemsize

    cb, hb = _choose_tiling(NC, Ho, W, x.dtype.itemsize, out_dtype.itemsize, c_bytes,
                            _VMEM_BUDGET_BYTES, channel_block, row_block)
    n_c, n_r = NC // cb, Ho // hb
    row_tiled = n_r > 1

    # Free metadata reshape: view row k = [x[2k, :], x[2k+1, :]] along lanes.
    xr = x.reshape(NC, Ho, 2 * W)
    hm = jnp.asarray(_hmat(kh, W), dtype=compute_dtype)

    kernel = _make_kernel(kv, W, Wo, cb, hb, n_r, compute_dtype,
                          lax.Precision.HIGHEST, row_tiled)

    if row_tiled:
        hb8 = hb // 8
        nblk8 = Ho // 8
        grid = (n_c, n_r)
        in_specs = [
            pl.BlockSpec((cb, hb, 2 * W), lambda ci, ri: (ci, ri, 0)),
            # 8-row aligned halo blocks; out-of-image fetches are clamped and masked
            # inside the kernel with pl.when.
            pl.BlockSpec((cb, 8, 2 * W),
                         lambda ci, ri: (ci, jnp.maximum(ri * hb8 - 1, 0), 0)),
            pl.BlockSpec((cb, 8, 2 * W),
                         lambda ci, ri: (ci, jnp.minimum((ri + 1) * hb8, nblk8 - 1), 0)),
            pl.BlockSpec((W, Wo), lambda ci, ri: (0, 0)),
        ]
        out_specs = pl.BlockSpec((cb, hb, Wo), lambda ci, ri: (ci, ri, 0))
        operands = (xr, xr, xr, hm)
        dims = ("parallel", "parallel")
    else:
        grid = (n_c,)
        in_specs = [
            pl.BlockSpec((cb, Ho, 2 * W), lambda ci: (ci, 0, 0)),
            pl.BlockSpec((W, Wo), lambda ci: (0, 0)),
        ]
        out_specs = pl.BlockSpec((cb, Ho, Wo), lambda ci: (ci, 0, 0))
        operands = (xr, hm)
        dims = ("parallel",)

    out = pl.pallas_call(
        kernel,
        out_shape=jax.ShapeDtypeStruct((NC, Ho, Wo), out_dtype),
        grid=grid,
        in_specs=in_specs,
        out_specs=out_specs,
        scratch_shapes=[pltpu.VMEM((cb, hb, W), compute_dtype)],
        compiler_params=pltpu.CompilerParams(
            dimension_semantics=dims,
            vmem_limit_bytes=_VMEM_LIMIT_BYTES),
    )(*operands)

    # Free metadata reshape back to NCHW; no transposes anywhere in the wrapper.
    return out.reshape(N, C, Ho, Wo)


def _reference_downsample(x, filter=(1, 3, 3, 1), gain=1.0):
    """Pure-JAX reference: depthwise conv2d, stride 2, pad 1 (== F.conv2d, groups=C)."""
    N, C, H, W = x.shape
    f = np.asarray(filter, dtype=np.float64)
    K = np.outer(f, f)
    K = (K / K.sum() * gain).astype(np.float32)
    w = jnp.broadcast_to(jnp.asarray(K)[None, None], (C, 1, K.shape[0], K.shape[1]))
    return lax.conv_general_dilated(
        x.astype(jnp.float32), w,
        window_strides=(2, 2),
        padding=((1, 1), (1, 1)),
        dimension_numbers=("NCHW", "OIHW", "NCHW"),
        feature_group_count=C,
        precision=lax.Precision.HIGHEST,
    )


if __name__ == "__main__":
    key = jax.random.PRNGKey(0)
    ks = jax.random.split(key, 6)

    def check(x, *, rtol=1e-5, atol=1e-5, **kw):
        out = jax.block_until_ready(downsample_fir(x, **kw))
        ref = jax.block_until_ready(_reference_downsample(x))
        assert out.shape == ref.shape, (out.shape, ref.shape)
        np.testing.assert_allclose(np.asarray(out.astype(jnp.float32)),
                                   np.asarray(ref), rtol=rtol, atol=atol)
        return out

    # 1) Module-spec shape (N=2, C=4, 16x16): single block, whole image resident.
    x1 = jax.random.normal(ks[0], (2, 4, 16, 16), dtype=jnp.float32)
    o1 = check(x1)
    assert o1.shape == (2, 4, 8, 8), o1.shape

    # 2) Many channels fused into one block (NC = 256).
    x2 = jax.random.normal(ks[1], (2, 128, 16, 16), dtype=jnp.float32)
    check(x2)

    # 3) Multi-step channel grid (grid=(8,)); the tap matrix is fetched once and reused.
    x3 = jax.random.normal(ks[2], (2, 64, 32, 32), dtype=jnp.float32)
    check(x3, channel_block=16)

    # 4) Row-tiled path with 1-row halos across blocks (grid=(1, 4)).
    x4 = jax.random.normal(ks[3], (1, 2, 256, 256), dtype=jnp.float32)
    check(x4, row_block=32)

    # 5) Wide image (Wo = 256): panel-blocked MXU matmul for the horizontal pass.
    x5 = jax.random.normal(ks[4], (1, 1, 64, 512), dtype=jnp.float32)
    check(x5)

    # 6) bf16 activations stay bf16 through HBM; taps run in bf16, MXU accumulates f32.
    x6 = jax.random.normal(ks[5], (2, 4, 16, 16), dtype=jnp.bfloat16)
    o6 = check(x6, rtol=2e-2, atol=2e-2)
    assert o6.dtype == jnp.bfloat16

    print("KERNEL_OK")
</pallas_src>

<mosaic_0001>
module attributes {stable_mosaic.version = 11 : i64} {
  func.func @kernel(%arg0: i32, %arg1: memref<8x8x32xf32, #tpu.memory_space<vmem>>, %arg2: memref<16x8xf32, #tpu.memory_space<vmem>>, %arg3: memref<8x8x8xf32, #tpu.memory_space<vmem>>, %arg4: memref<8x8x16xf32, #tpu.memory_space<vmem>>) attributes {dimension_semantics = [#tpu.dimension_semantics<parallel>], iteration_bounds = array<i64: 1>, scalar_prefetch = 0 : i64, scratch_operands = 1 : i64, tpu.core_type = #tpu.core_type<tc>, window_params = [{transform_indices = @transform_0, window_bounds = array<i64: 8, 8, 32>}, {pipeline_mode = #tpu.pipeline_mode<synchronous>, transform_indices = @transform_1, window_bounds = array<i64: 16, 8>}, {transform_indices = @transform_2, window_bounds = array<i64: 8, 8, 8>}]} {
    %c0 = arith.constant 0 : index
    %c0_0 = arith.constant 0 : index
    %c0_1 = arith.constant 0 : index
    %0 = vector.load %arg1[%c0, %c0_0, %c0_1] : memref<8x8x32xf32, #tpu.memory_space<vmem>>, vector<8x8x16xf32>
    %c0_2 = arith.constant 0 : index
    %c0_3 = arith.constant 0 : index
    %c16 = arith.constant 16 : index
    %1 = vector.load %arg1[%c0_2, %c0_3, %c16] : memref<8x8x32xf32, #tpu.memory_space<vmem>>, vector<8x8x16xf32>
    %cst = arith.constant 3.750000e-01 : f32
    %2 = vector.broadcast %cst : f32 to vector<8x8x16xf32>
    %3 = arith.mulf %2, %0 : vector<8x8x16xf32>
    %cst_4 = arith.constant 3.750000e-01 : f32
    %4 = vector.broadcast %cst_4 : f32 to vector<8x8x16xf32>
    %5 = arith.mulf %4, %1 : vector<8x8x16xf32>
    %6 = arith.addf %3, %5 : vector<8x8x16xf32>
    %c0_5 = arith.constant 0 : index
    %c0_6 = arith.constant 0 : index
    %c0_7 = arith.constant 0 : index
    %7 = vector.load %arg4[%c0_5, %c0_6, %c0_7] : memref<8x8x16xf32, #tpu.memory_space<vmem>>, vector<8x8x16xf32>
    tpu.vector_store %arg4[%c0_5, %c0_6, %c0_7], %6 {strides = array<i32>} : memref<8x8x16xf32, #tpu.memory_space<vmem>>, vector<8x8x16xf32>,
    %c0_8 = arith.constant 0 : index
    %c1 = arith.constant 1 : index
    %c0_9 = arith.constant 0 : index
    %8 = vector.load %arg4[%c0_8, %c1, %c0_9] : memref<8x8x16xf32, #tpu.memory_space<vmem>>, vector<8x7x16xf32>
    %9 = vector.extract_strided_slice %1 {offsets = [0, 0, 0], sizes = [8, 7, 16], strides = [1, 1, 1]} : vector<8x8x16xf32> to vector<8x7x16xf32>
    %cst_10 = arith.constant 1.250000e-01 : f32
    %10 = vector.broadcast %cst_10 : f32 to vector<8x7x16xf32>
    %11 = arith.mulf %10, %9 : vector<8x7x16xf32>
    %12 = arith.addf %8, %11 : vector<8x7x16xf32>
    %c0_11 = arith.constant 0 : index
    %c1_12 = arith.constant 1 : index
    %c0_13 = arith.constant 0 : index
    %13 = vector.load %arg4[%c0_11, %c1_12, %c0_13] : memref<8x8x16xf32, #tpu.memory_space<vmem>>, vector<8x7x16xf32>
    tpu.vector_store %arg4[%c0_11, %c1_12, %c0_13], %12 {strides = array<i32>} : memref<8x8x16xf32, #tpu.memory_space<vmem>>, vector<8x7x16xf32>,
    %c0_14 = arith.constant 0 : index
    %c0_15 = arith.constant 0 : index
    %c0_16 = arith.constant 0 : index
    %14 = vector.load %arg4[%c0_14, %c0_15, %c0_16] : memref<8x8x16xf32, #tpu.memory_space<vmem>>, vector<8x7x16xf32>
    %15 = vector.extract_strided_slice %0 {offsets = [0, 1, 0], sizes = [8, 7, 16], strides = [1, 1, 1]} : vector<8x8x16xf32> to vector<8x7x16xf32>
    %cst_17 = arith.constant 1.250000e-01 : f32
    %16 = vector.broadcast %cst_17 : f32 to vector<8x7x16xf32>
    %17 = arith.mulf %16, %15 : vector<8x7x16xf32>
    %18 = arith.addf %14, %17 : vector<8x7x16xf32>
    %c0_18 = arith.constant 0 : index
    %c0_19 = arith.constant 0 : index
    %c0_20 = arith.constant 0 : index
    %19 = vector.load %arg4[%c0_18, %c0_19, %c0_20] : memref<8x8x16xf32, #tpu.memory_space<vmem>>, vector<8x7x16xf32>
    tpu.vector_store %arg4[%c0_18, %c0_19, %c0_20], %18 {strides = array<i32>} : memref<8x8x16xf32, #tpu.memory_space<vmem>>, vector<8x7x16xf32>,
    %c0_21 = arith.constant 0 : index
    %c0_22 = arith.constant 0 : index
    %c0_23 = arith.constant 0 : index
    %20 = vector.load %arg4[%c0_21, %c0_22, %c0_23] : memref<8x8x16xf32, #tpu.memory_space<vmem>>, vector<8x8x16xf32>
    %21 = vector.shape_cast %20 : vector<8x8x16xf32> to vector<64x16xf32>
    %c0_24 = arith.constant 0 : index
    %c0_25 = arith.constant 0 : index
    %22 = vector.load %arg2[%c0_24, %c0_25] : memref<16x8xf32, #tpu.memory_space<vmem>>, vector<16x8xf32>
    %cst_26 = arith.constant dense<0.000000e+00> : vector<64x8xf32>
    %23 = tpu.matmul %21, %22, %cst_26 {dimension_numbers = #tpu.dot_dimension_numbers<[1], [0], [0], [1], [0, 0, 1, 1], [], []>, precision = #tpu.contract_precision<fp32>} : vector<64x16xf32>, vector<16x8xf32>, vector<64x8xf32> -> vector<64x8xf32>
    %24 = vector.shape_cast %23 : vector<64x8xf32> to vector<8x8x8xf32>
    %c0_27 = arith.constant 0 : index
    %c0_28 = arith.constant 0 : index
    %c0_29 = arith.constant 0 : index
    %25 = vector.load %arg3[%c0_27, %c0_28, %c0_29] : memref<8x8x8xf32, #tpu.memory_space<vmem>>, vector<8x8x8xf32>
    tpu.vector_store %arg3[%c0_27, %c0_28, %c0_29], %24 {strides = array<i32>} : memref<8x8x8xf32, #tpu.memory_space<vmem>>, vector<8x8x8xf32>,
    return
  }
  func.func @transform_0(%arg0: i32) -> (i32, i32, i32) {
    %c0_i32 = arith.constant 0 : i32
    %c0_i32_0 = arith.constant 0 : i32
    %c0_i32_1 = arith.constant 0 : i32
    return %arg0, %c0_i32, %c0_i32_0 : i32, i32, i32
  }
  func.func @transform_1(%arg0: i32) -> (i32, i32) {
    %c0_i32 = arith.constant 0 : i32
    %c0_i32_0 = arith.constant 0 : i32
    %c0_i32_1 = arith.constant 0 : i32
    return %c0_i32, %c0_i32_0 : i32, i32
  }
  func.func @transform_2(%arg0: i32) -> (i32, i32, i32) {
    %c0_i32 = arith.constant 0 : i32
    %c0_i32_0 = arith.constant 0 : i32
    %c0_i32_1 = arith.constant 0 : i32
    return %arg0, %c0_i32, %c0_i32_0 : i32, i32, i32
  }
}

</mosaic_0001>

<bundles_post_ra>
// kernel: downsample_fir.1
= control target key start
LH: loop header
LB: loop body
LE: loop exit
PB: predicated region body
PF: predicated region fallthrough
CT: control target
= control target key end

     0   :  { %s653_s15 = smov 112   ;;  %s888_s0 = inlined_call_operand.vmem [shape: f32[8,8,32], index: 0, kind: input, shape index: {}]   ;;  %s889_s1 = inlined_call_operand.vmem [shape: f32[16,8], index: 1, kind: input, shape index: {}]   ;;  %s890_s2 = inlined_call_operand.hbm [shape: f32[8,8,8], index: 2, kind: output, shape index: {}]  }
   0x1   :  { %v16_v0 = vld [vmem:[%s888_s0 + $0x20] sm:$0xff]  ;;  %v18_v2 = vld [vmem:[%s888_s0 + $0x30] sm:$0xff]  ;;  %v17_v6 = vld [vmem:[%s888_s0 + $0x28] sm:$0xff] }
   0x2   :  { %v12_v1 = vld [vmem:[%s888_s0] sm:$0xff]  ;;  %v681_v3 = vmul.f32 0.375, %v16_v0  ;;  %v26_v5 = vmul.f32 0.375, %v18_v2 }
   0x3   :  { %v683_v4 = vmul.f32 0.375, %v12_v1 }
   0x4   :  { %44 = vrot.lane.b32.xlu0 %v681_v3, %s653_s15  ;;  %48 = vrot.lane.b32.xlu2 %v26_v5, %s653_s15 }
   0x5   :  { %36 = vrot.lane.b32.xlu1 %v683_v4, %s653_s15 }
   0x6   :  { %7 = vsyncpa [#allocation4], 0  ;;  %v13_v7 = vld [vmem:[%s888_s0 + $0x8] sm:$0xff]  ;;  %v696_v8 = vmul.f32 0.125, %v16_v0  ;;  %v698_v9 = vmul.f32 0.375, %v17_v6  ;;  %v19_v11 = vld [vmem:[%s888_s0 + $0x38] sm:$0xff] }
   0x7   :  { %v21_v10 = vmul.f32 0.375, %v13_v7  ;;  %v708_v12 = vmul.f32 0.125, %v12_v1  ;;  %v710_v13 = vmul.f32 0.125, %v17_v6  ;;  %v27_v14 = vmul.f32 0.375, %v19_v11  ;;  %v14_v15 = vld [vmem:[%s888_s0 + $0x10] sm:$0xff]  ;;  %v15_v19 = vld [vmem:[%s888_s0 + $0x18] sm:$0xff] }
   0x8   :  { %v720_v16 = vmul.f32 0.125, %v18_v2  ;;  %v722_v17 = vmul.f32 0.375, %v14_v15  ;;  %v724_v18 = vmul.f32 0.125, %v13_v7  ;;  %v735_v20 = vmul.f32 0.375, %v15_v19  ;;  %v191_v28 = vld [vmem:[%s889_s1 + $0x8] sm:$0xff]  ;;  %v190_v30 = vld [vmem:[%s889_s1] sm:$0xff] }
   0x9   :  { %v737_v21 = vmul.f32 0.125, %v19_v11  ;;  %v739_v22 = vmul.f32 0.125, %v14_v15  ;;  %v747_v23 = vmul.f32 0.125, %v15_v19  ;;  %vm68_vm0 = vcmask 130048   ;;  %s654_s1 = smov [#allocation3]   ;;  %s607_s4 = sshll.u32 %s890_s2, 4  ;;  %s608_s4 = int_to_ptr.hbm [resolvable:$true] %s607_s4 }
   0xa   :  { %v230_v29 = vand.u32 4294901760, %v191_v28  ;;  %v232_v32 = vand.u32 4294901760, %v190_v30  ;;  %vm133_vm1 = vcmask 129024   ;;  %v151_v51 = vrot.slane %v724_v18, 1  ;;  %s605_s29 = sshll.u32 %s654_s1, 4  ;;  %s655_s5 = smov 128   ;;  %s606_s29 = int_to_ptr.vmem [resolvable:$true] %s605_s29 }
   0xb   :  { %v154_v60 = vrot.slane %v696_v8, 1  ;;  %v150_v2 = vrot.slane %v708_v12, 1  ;;  %v155_v6 = vrot.slane %v710_v13, 1  ;;  %vm592_vm2 = vcmask 64512   ;;  %s656_s6 = smov 8  }
   0xc   :  { %46 = vrot.lane.b32.xlu0 %v698_v9, %s653_s15  ;;  %38 = vrot.lane.b32.xlu2 %v21_v10, %s653_s15  ;;  %v314_v31 = vsub.f32 %v191_v28, %v230_v29  ;;  %v320_v36 = vsub.f32 %v190_v30, %v232_v32 }
   0xd   :  { %109 = vrot.lane.b32.xlu1 %v696_v8, %s653_s15  ;;  %619 = vmatpush.msra.mxu2 %v230_v29 }
   0xe   :  { %231 = vmatpush.msra.mxu0 %v230_v29  ;;  %v315_v35 = vand.u32 4294901760, %v314_v31  ;;  %v321_v38 = vand.u32 4294901760, %v320_v36 }
   0xf   :  { %620 = vmatpush.msra.mxu2 %v232_v32 }
  0x10   :  { %233 = vmatpush.msra.mxu0 %v232_v32  ;;  %v316_v37 = vsub.f32 %v314_v31, %v315_v35  ;;  %v322_v40 = vsub.f32 %v320_v36, %v321_v38 }
  0x11   :  { %374 = vmatpush.msrb.mxu2 %v314_v31 }
  0x12   :  { %503 = vmatpush.msrb.mxu0 %v315_v35  ;;  %v317_v39 = vand.u32 4294901760, %v316_v37  ;;  %v323_v44 = vand.u32 4294901760, %v322_v40 }
  0x13   :  { %377 = vmatpush.msrb.mxu2 %v320_v36 }
  0x14   :  { %111 = vrot.lane.b32.xlu0 %v710_v13, %s653_s15  ;;  %50 = vrot.lane.b32.xlu2 %v27_v14, %s653_s15  ;;  %v156_v13 = vrot.slane %v720_v16, 1 }
  0x15   :  { %101 = vrot.lane.b32.xlu1 %v708_v12, %s653_s15  ;;  %507 = vmatpush.msrb.mxu0 %v321_v38 }
  0x16   :  { %621 = vmatpush.msra.mxu3 %v317_v39  ;;  %318 = vmatpush.msra.mxu1 %v317_v39 }
  0x18   :  { %622 = vmatpush.msra.mxu3 %v323_v44  ;;  %324 = vmatpush.msra.mxu1 %v323_v44 }
  0x1a   :  { %434 = vmatpush.msrb.mxu3 %v230_v29  ;;  %556 = vmatpush.msrb.mxu1 %v230_v29 }
  0x1c   :  { %40 = vrot.lane.b32.xlu0 %v722_v17, %s653_s15  ;;  %103 = vrot.lane.b32.xlu2 %v724_v18, %s653_s15 }
  0x1d   :  { %113 = vrot.lane.b32.xlu1 %v720_v16, %s653_s15  ;;  %436 = vmatpush.msrb.mxu3 %v232_v32 }
  0x1e   :  { %558 = vmatpush.msrb.mxu1 %v232_v32 }
  0x24   :  { %42 = vrot.lane.b32.xlu0 %v735_v20, %s653_s15  ;;  %105 = vrot.lane.b32.xlu2 %v739_v22, %s653_s15 }
  0x25   :  { %115 = vrot.lane.b32.xlu1 %v737_v21, %s653_s15 }
  0x2c   :  { %107 = vrot.lane.b32.xlu0 %v747_v23, %s653_s15 }
  0x5e   :  { %v49_v24 = vpop.permute.xlu2 %48 }
  0x5f   :  { %v66_v25 = vadd.f32 %v49_v24, %v26_v5 }
  0x61   :  { %75 = vst.msk [vmem:[#allocation2 + $0x30] sm:$0xff] %vm68_vm0, %v66_v25 }
  0x66   :  { %v39_v26 = vpop.permute.xlu2 %38 }
  0x67   :  { %v61_v27 = vadd.f32 %v39_v26, %v21_v10 }
  0x69   :  { %70 = vst.msk [vmem:[#allocation2 + $0x8] sm:$0xff] %vm68_vm0, %v61_v27 }
  0x6e   :  { %v51_v33 = vpop.permute.xlu2 %50 }
  0x6f   :  { %v67_v34 = vadd.f32 %v51_v33, %v27_v14 }
  0x70   :  { %v78_v41 = vld [vmem:[#allocation2 + $0x9] sm:$0x7f] }
  0x71   :  { %76 = vst.msk [vmem:[#allocation2 + $0x38] sm:$0xff] %vm68_vm0, %v67_v34 }
  0x76   :  { %v45_v42 = vpop.permute.xlu0 %44  ;;  %v104_v47 = vpop.permute.xlu2 %103 }
  0x77   :  { %v37_v43 = vpop.permute.xlu1 %36  ;;  %v64_v45 = vadd.f32 %v45_v42, %v681_v3  ;;  %v126_v48 = vadd.f32 %v104_v47, %v78_v41  ;;  %v157_v41 = vrot.slane %v737_v21, 1 }
  0x78   :  { %v60_v46 = vadd.f32 %v37_v43, %v683_v4  ;;  %v83_v4 = vld [vmem:[#allocation2 + $0x31] sm:$0x7f]  ;;  %v84_v19 = vld [vmem:[#allocation2 + $0x39] sm:$0x7f] }
  0x79   :  { %73 = vst.msk [vmem:[#allocation2 + $0x20] sm:$0xff] %vm68_vm0, %v64_v45 }
  0x7a   :  { %69 = vst.msk [vmem:[#allocation2] sm:$0xff] %vm68_vm0, %v60_v46  ;;  %v152_v46 = vrot.slane %v739_v22, 1 }
  0x7b   :  { %135 = vst.msk [vmem:[#allocation2 + $0x9] sm:$0x7f] %vm133_vm1, %v126_v48 }
  0x7e   :  { %v47_v49 = vpop.permute.xlu0 %46  ;;  %v106_v15 = vpop.permute.xlu2 %105 }
  0x7f   :  { %v110_v50 = vpop.permute.xlu1 %109  ;;  %v65_v52 = vadd.f32 %v47_v49, %v698_v9 }
  0x80   :  { %v81_v53 = vld [vmem:[#allocation2 + $0x21] sm:$0x7f] }
  0x81   :  { %74 = vst.msk [vmem:[#allocation2 + $0x28] sm:$0xff] %vm68_vm0, %v65_v52  ;;  %v129_v54 = vadd.f32 %v110_v50, %v81_v53  ;;  %v77_v58 = vld [vmem:[#allocation2 + $0x1] sm:$0x7f] }
  0x82   :  { %v143_v55 = vld [vmem:[#allocation2 + $0x8] sm:$0x7f] }
  0x83   :  { %v167_v56 = vadd.f32 %v151_v51, %v143_v55  ;;  %138 = vst.msk [vmem:[#allocation2 + $0x21] sm:$0x7f] %vm133_vm1, %v129_v54 }
  0x85   :  { %175 = vst.msk [vmem:[#allocation2 + $0x8] sm:$0x7f] %vm133_vm1, %v167_v56 }
  0x86   :  { %v112_v57 = vpop.permute.xlu0 %111 }
  0x87   :  { %v102_v59 = vpop.permute.xlu1 %101 }
  0x88   :  { %v125_v61 = vadd.f32 %v102_v59, %v77_v58  ;;  %v82_v62 = vld [vmem:[#allocation2 + $0x29] sm:$0x7f] }
  0x89   :  { %v130_v63 = vadd.f32 %v112_v57, %v82_v62 }
  0x8a   :  { %134 = vst.msk [vmem:[#allocation2 + $0x1] sm:$0x7f] %vm133_vm1, %v125_v61  ;;  %v146_v0 = vld [vmem:[#allocation2 + $0x20] sm:$0x7f] }
  0x8b   :  { %v170_v1 = vadd.f32 %v154_v60, %v146_v0  ;;  %139 = vst.msk [vmem:[#allocation2 + $0x29] sm:$0x7f] %vm133_vm1, %v130_v63  ;;  %v153_v63 = vrot.slane %v747_v23, 1 }
  0x8c   :  { %v183_v26 = vld [vmem:[#allocation2 + $0x8] sm:$0xff] }
  0x8d   :  { %178 = vst.msk [vmem:[#allocation2 + $0x20] sm:$0x7f] %vm133_vm1, %v170_v1  ;;  %v196_v16 = vsel %vm68_vm0, %v183_v26, 0 }
  0x8e   :  { %v41_v3 = vpop.permute.xlu0 %40  ;;  %v802_v39 = vand.u32 4294901760, %v196_v16 }
  0x8f   :  { %v114_v5 = vpop.permute.xlu1 %113  ;;  %v62_v7 = vadd.f32 %v41_v3, %v722_v17 }
  0x90   :  { %v131_v8 = vadd.f32 %v114_v5, %v83_v4  ;;  %v819_v21 = vsub.f32 %v196_v16, %v802_v39 }
  0x91   :  { %v142_v9 = vld [vmem:[#allocation2] sm:$0x7f]  ;;  %71 = vst.msk [vmem:[#allocation2 + $0x10] sm:$0xff] %vm68_vm0, %v62_v7 }
  0x92   :  { %v166_v10 = vadd.f32 %v150_v2, %v142_v9  ;;  %v147_v11 = vld [vmem:[#allocation2 + $0x28] sm:$0x7f]  ;;  %140 = vst.msk [vmem:[#allocation2 + $0x31] sm:$0x7f] %vm133_vm1, %v131_v8  ;;  %v244_v60 = vand.u32 4294901760, %v819_v21 }
  0x93   :  { %v171_v14 = vadd.f32 %v155_v6, %v147_v11 }
  0x94   :  { %174 = vst.msk [vmem:[#allocation2] sm:$0x7f] %vm133_vm1, %v166_v10  ;;  %v186_v12 = vld [vmem:[#allocation2 + $0x20] sm:$0xff]  ;;  %v245_v1 = vsub.f32 %v819_v21, %v244_v60 }
  0x95   :  { %179 = vst.msk [vmem:[#allocation2 + $0x28] sm:$0x7f] %vm133_vm1, %v171_v14  ;;  %v205_v18 = vsel %vm68_vm0, %v186_v12, 0 }
  0x96   :  { %v43_v17 = vpop.permute.xlu0 %42  ;;  %v783_v25 = vand.u32 4294901760, %v205_v18  ;;  %v246_v7 = vand.u32 4294901760, %v245_v1 }
  0x97   :  { %v116_v24 = vpop.permute.xlu1 %115  ;;  %v63_v27 = vadd.f32 %v43_v17, %v735_v20 }
  0x98   :  { %v132_v28 = vadd.f32 %v116_v24, %v84_v19  ;;  %v79_v29 = vld [vmem:[#allocation2 + $0x11] sm:$0x7f]  ;;  %342 = vmatmul.f32.vlgmr.msra.gmra.mxu3 %v783_v25  ;;  %v788_v30 = vsub.f32 %v205_v18, %v783_v25 }
  0x99   :  { %v148_v31 = vld [vmem:[#allocation2 + $0x30] sm:$0x7f]  ;;  %72 = vst.msk [vmem:[#allocation2 + $0x18] sm:$0xff] %vm68_vm0, %v63_v27  ;;  %v127_v32 = vadd.f32 %v106_v15, %v79_v29 }
  0x9a   :  { %v172_v33 = vadd.f32 %v156_v13, %v148_v31  ;;  %141 = vst.msk [vmem:[#allocation2 + $0x39] sm:$0x7f] %vm133_vm1, %v132_v28  ;;  %v268_v35 = vand.u32 4294901760, %v788_v30 }
  0x9b   :  { %v182_v34 = vld [vmem:[#allocation2] sm:$0xff]  ;;  %136 = vst.msk [vmem:[#allocation2 + $0x11] sm:$0x7f] %vm133_vm1, %v127_v32 }
  0x9c   :  { %v193_v20 = vsel %vm68_vm0, %v182_v34, 0  ;;  %180 = vst.msk [vmem:[#allocation2 + $0x30] sm:$0x7f] %vm133_vm1, %v172_v33  ;;  %v269_v37 = vsub.f32 %v788_v30, %v268_v35  ;;  %v187_v38 = vld [vmem:[#allocation2 + $0x28] sm:$0xff] }
  0x9d   :  { %v797_v36 = vand.u32 4294901760, %v193_v20  ;;  %v208_v40 = vsel %vm68_vm0, %v187_v38, 0 }
  0x9e   :  { %v108_v42 = vpop.permute.xlu0 %107  ;;  %v270_v43 = vand.u32 4294901760, %v269_v37  ;;  %v807_v44 = vand.u32 4294901760, %v208_v40 }
  0x9f   :  { %326 = vmatmul.f32.vlgmr.msra.gmra.mxu1 %v797_v36  ;;  %v810_v45 = vsub.f32 %v193_v20, %v797_v36 }
  0xa0   :  { %v80_v47 = vld [vmem:[#allocation2 + $0x19] sm:$0x7f]  ;;  %271 = vmatmul.f32.vlgmr.msra.gmra.mxu2 %v270_v43  ;;  %346 = vmatmul.f32.gmra.mxu3 %v807_v44  ;;  %v816_v49 = vsub.f32 %v208_v40, %v807_v44 }
  0xa1   :  { %v236_v48 = vand.u32 4294901760, %v810_v45  ;;  %v149_v50 = vld [vmem:[#allocation2 + $0x38] sm:$0x7f]  ;;  %v128_v51 = vadd.f32 %v108_v42, %v80_v47 }
  0xa2   :  { %v173_v52 = vadd.f32 %v157_v41, %v149_v50  ;;  %v144_v53 = vld [vmem:[#allocation2 + $0x10] sm:$0x7f]  ;;  %v276_v22 = vand.u32 4294901760, %v816_v49 }
  0xa3   :  { %v237_v54 = vsub.f32 %v810_v45, %v236_v48  ;;  %v168_v55 = vadd.f32 %v152_v46, %v144_v53  ;;  %137 = vst.msk [vmem:[#allocation2 + $0x19] sm:$0x7f] %vm133_vm1, %v128_v51  ;;  %v188_v56 = vld [vmem:[#allocation2 + $0x30] sm:$0xff] }
  0xa4   :  { %181 = vst.msk [vmem:[#allocation2 + $0x38] sm:$0x7f] %vm133_vm1, %v173_v52  ;;  %v277_v58 = vsub.f32 %v816_v49, %v276_v22  ;;  %v211_v59 = vsel %vm68_vm0, %v188_v56, 0 }
  0xa5   :  { %v238_v57 = vand.u32 4294901760, %v237_v54  ;;  %176 = vst.msk [vmem:[#allocation2 + $0x10] sm:$0x7f] %vm133_vm1, %v168_v55  ;;  %v831_v61 = vand.u32 4294901760, %v211_v59 }
  0xa6   :  { %v278_v62 = vand.u32 4294901760, %v277_v58 }
  0xa7   :  { %239 = vmatmul.f32.vlgmr.msra.gmra.mxu0 %v238_v57  ;;  %330 = vmatmul.f32.gmra.mxu1 %v802_v39  ;;  %v836_v0 = vsub.f32 %v211_v59, %v831_v61 }
  0xa8   :  { %279 = vmatmul.f32.gmra.mxu2 %v278_v62  ;;  %350 = vmatmul.f32.gmra.mxu3 %v831_v61 }
  0xa9   :  { %v284_v2 = vand.u32 4294901760, %v836_v0 }
  0xaa   :  { %v145_v3 = vld [vmem:[#allocation2 + $0x18] sm:$0x7f] }
  0xab   :  { %v169_v4 = vadd.f32 %v153_v63, %v145_v3  ;;  %v285_v5 = vsub.f32 %v836_v0, %v284_v2  ;;  %v189_v6 = vld [vmem:[#allocation2 + $0x38] sm:$0xff] }
  0xac   :  { %v184_v8 = vld [vmem:[#allocation2 + $0x10] sm:$0xff]  ;;  %v214_v9 = vsel %vm68_vm0, %v189_v6, 0 }
  0xad   :  { %177 = vst.msk [vmem:[#allocation2 + $0x18] sm:$0x7f] %vm133_vm1, %v169_v4  ;;  %v199_v23 = vsel %vm68_vm0, %v184_v8, 0  ;;  %v290_v10 = vand.u32 4294901760, %v214_v9  ;;  %v286_v11 = vand.u32 4294901760, %v285_v5 }
  0xae   :  { %v250_v14 = vand.u32 4294901760, %v199_v23 }
  0xaf   :  { %247 = vmatmul.f32.gmra.mxu0 %v246_v7  ;;  %v291_v12 = vsub.f32 %v214_v9, %v290_v10 }
  0xb0   :  { %287 = vmatmul.f32.gmra.mxu2 %v286_v11  ;;  %334 = vmatmul.f32.gmra.mxu1 %v250_v14  ;;  %v251_v15 = vsub.f32 %v199_v23, %v250_v14 }
  0xb1   :  { %354 = vmatmul.f32.gmra.mxu3 %v290_v10  ;;  %v292_v18 = vand.u32 4294901760, %v291_v12 }
  0xb2   :  { %v252_v13 = vand.u32 4294901760, %v251_v15 }
  0xb3   :  { %v293_v17 = vsub.f32 %v291_v12, %v292_v18 }
  0xb4   :  { %v253_v19 = vsub.f32 %v251_v15, %v252_v13  ;;  %v185_v24 = vld [vmem:[#allocation2 + $0x18] sm:$0xff] }
  0xb5   :  { %v202_v26 = vsel %vm68_vm0, %v185_v24, 0  ;;  %v294_v28 = vand.u32 4294901760, %v293_v17 }
  0xb6   :  { %v254_v27 = vand.u32 4294901760, %v253_v19  ;;  %v258_v29 = vand.u32 4294901760, %v202_v26 }
  0xb8   :  { %255 = vmatmul.f32.gmra.mxu0 %v254_v27  ;;  %295 = vmatmul.f32.gmra.mxu2 %v294_v28  ;;  %v259_v31 = vsub.f32 %v202_v26, %v258_v29 }
  0xb9   :  { %338 = vmatmul.f32.gmra.mxu1 %v258_v29  ;;  %440 = vmatmul.f32.vlgmr.msrb.gmra.mxu3 %v236_v48 }
  0xba   :  { %v260_v32 = vand.u32 4294901760, %v259_v31 }
  0xbc   :  { %v261_v16 = vsub.f32 %v259_v31, %v260_v32 }
  0xbe   :  { %v262_v33 = vand.u32 4294901760, %v261_v16 }
  0xc0   :  { %263 = vmatmul.f32.gmra.mxu0 %v262_v33  ;;  %380 = vmatmul.f32.vlgmr.msrb.gmra.mxu2 %v810_v45 }
  0xc1   :  { %446 = vmatmul.f32.gmra.mxu3 %v244_v60  ;;  %560 = vmatmul.f32.vlgmr.msrb.gmra.mxu1 %v797_v36 }
  0xc8   :  { %385 = vmatmul.f32.gmra.mxu2 %v819_v21  ;;  %509 = vmatmul.f32.vlgmr.msrb.gmra.mxu0 %v797_v36 }
  0xc9   :  { %452 = vmatmul.f32.gmra.mxu3 %v252_v13  ;;  %564 = vmatmul.f32.gmra.mxu1 %v802_v39 }
  0xd0   :  { %390 = vmatmul.f32.gmra.mxu2 %v251_v15  ;;  %513 = vmatmul.f32.gmra.mxu0 %v802_v39 }
  0xd1   :  { %458 = vmatmul.f32.gmra.mxu3 %v260_v32  ;;  %568 = vmatmul.f32.gmra.mxu1 %v250_v14 }
  0xd8   :  { %395 = vmatmul.f32.gmra.mxu2 %v259_v31  ;;  %517 = vmatmul.f32.gmra.mxu0 %v250_v14 }
  0xd9   :  { %464 = vmatmul.f32.gmra.mxu3 %v268_v35  ;;  %572 = vmatmul.f32.gmra.mxu1 %v258_v29 }
  0xe0   :  { %400 = vmatmul.f32.gmra.mxu2 %v788_v30  ;;  %521 = vmatmul.f32.gmra.mxu0 %v258_v29 }
  0xe1   :  { %470 = vmatmul.f32.gmra.mxu3 %v276_v22  ;;  %576 = vmatmul.f32.gmra.mxu1 %v783_v25 }
  0xe8   :  { %405 = vmatmul.f32.gmra.mxu2 %v816_v49  ;;  %525 = vmatmul.f32.gmra.mxu0 %v783_v25 }
  0xe9   :  { %476 = vmatmul.f32.gmra.mxu3 %v284_v2  ;;  %580 = vmatmul.f32.gmra.mxu1 %v807_v44 }
  0xf0   :  { %410 = vmatmul.f32.gmra.mxu2 %v836_v0  ;;  %529 = vmatmul.f32.gmra.mxu0 %v807_v44 }
  0xf1   :  { %482 = vmatmul.f32.gmra.mxu3 %v292_v18  ;;  %584 = vmatmul.f32.gmra.mxu1 %v831_v61 }
  0xf8   :  { %415 = vmatmul.f32.gmra.mxu2 %v291_v12  ;;  %533 = vmatmul.f32.gmra.mxu0 %v831_v61 }
  0xf9   :  { %588 = vmatmul.f32.gmra.mxu1 %v290_v10 }
 0x100   :  { %537 = vmatmul.f32.gmra.mxu0 %v290_v10 }
 0x11b   :  { %v343_v34 = vpop.f32.mrf.mxu3 }
 0x11c   :  { %v327_v30 = vpop.f32.mrf.mxu1 }
 0x123   :  { %v272_v20 = vpop.f32.mrf.mxu2  ;;  %v347_v25 = vpop.f32.mrf.mxu3 }
 0x124   :  { %v240_v35 = vpop.f32.mrf.mxu0  ;;  %v331_v36 = vpop.f32.mrf.mxu1  ;;  %v344_v13 = vadd.f32 %v343_v34, %v272_v20 }
 0x125   :  { %v328_v49 = vadd.f32 %v327_v30, %v240_v35 }
 0x12b   :  { %v280_v37 = vpop.f32.mrf.mxu2  ;;  %v865_v38 = vpop.f32.mrf.mxu3 }
 0x12c   :  { %v248_v39 = vpop.f32.mrf.mxu0  ;;  %v348_v32 = vadd.f32 %v347_v25, %v280_v37 }
 0x12d   :  { %v335_v40 = vpop.f32.mrf.mxu1  ;;  %v332_v55 = vadd.f32 %v331_v36, %v248_v39 }
 0x133   :  { %v867_v41 = vpop.f32.mrf.mxu2 }
 0x134   :  { %v869_v42 = vpop.f32.mrf.mxu3  ;;  %v352_v20 = vadd.f32 %v865_v38, %v867_v41 }
 0x135   :  { %v256_v43 = vpop.f32.mrf.mxu0 }
 0x136   :  { %v339_v44 = vpop.f32.mrf.mxu1  ;;  %v336_v0 = vadd.f32 %v335_v40, %v256_v43 }
 0x13b   :  { %v871_v45 = vpop.f32.mrf.mxu2 }
 0x13c   :  { %v441_v46 = vpop.f32.mrf.mxu3 }
 0x13d   :  { %v264_v47 = vpop.f32.mrf.mxu0 }
 0x13e   :  { %v561_v48 = vpop.f32.mrf.mxu1  ;;  %v340_v9 = vadd.f32 %v339_v44, %v264_v47 }
 0x143   :  { %v381_v21 = vpop.f32.mrf.mxu2 }
 0x144   :  { %v382_v50 = vadd.f32 %v381_v21, %v328_v49  ;;  %v447_v51 = vpop.f32.mrf.mxu3  ;;  %v356_v49 = vadd.f32 %v869_v42, %v871_v45 }
 0x145   :  { %v510_v52 = vpop.f32.mrf.mxu0 }
 0x146   :  { %v442_v53 = vadd.f32 %v441_v46, %v382_v50  ;;  %v565_v54 = vpop.f32.mrf.mxu1 }
 0x148   :  { %v511_v22 = vadd.f32 %v510_v52, %v442_v53 }
 0x14a   :  { %v562_v56 = vadd.f32 %v561_v48, %v511_v22 }
 0x14b   :  { %v386_v57 = vpop.f32.mrf.mxu2 }
 0x14c   :  { %593 = vst.msk [vmem:[#allocation3] sm:$0xff] %vm592_vm2, %v562_v56  ;;  %v387_v58 = vadd.f32 %v386_v57, %v332_v55  ;;  %v453_v59 = vpop.f32.mrf.mxu3 }
 0x14d   :  { %v514_v60 = vpop.f32.mrf.mxu0 }
 0x14e   :  { %v448_v61 = vadd.f32 %v447_v51, %v387_v58  ;;  %v569_v62 = vpop.f32.mrf.mxu1 }
 0x150   :  { %v515_v63 = vadd.f32 %v514_v60, %v448_v61 }
 0x152   :  { %v566_v1 = vadd.f32 %v565_v54, %v515_v63 }
 0x153   :  { %v391_v2 = vpop.f32.mrf.mxu2 }
 0x154   :  { %594 = vst.msk [vmem:[#allocation3 + $0x8] sm:$0xff] %vm592_vm2, %v566_v1  ;;  %v392_v3 = vadd.f32 %v391_v2, %v336_v0  ;;  %v459_v4 = vpop.f32.mrf.mxu3 }
 0x155   :  { %v518_v5 = vpop.f32.mrf.mxu0 }
 0x156   :  { %v454_v6 = vadd.f32 %v453_v59, %v392_v3  ;;  %v573_v8 = vpop.f32.mrf.mxu1 }
 0x158   :  { %v519_v7 = vadd.f32 %v518_v5, %v454_v6 }
 0x15a   :  { %v570_v23 = vadd.f32 %v569_v62, %v519_v7 }
 0x15b   :  { %v396_v10 = vpop.f32.mrf.mxu2 }
 0x15c   :  { %595 = vst.msk [vmem:[#allocation3 + $0x10] sm:$0xff] %vm592_vm2, %v570_v23  ;;  %v397_v11 = vadd.f32 %v396_v10, %v340_v9  ;;  %v465_v15 = vpop.f32.mrf.mxu3 }
 0x15d   :  { %v522_v14 = vpop.f32.mrf.mxu0 }
 0x15e   :  { %v460_v12 = vadd.f32 %v459_v4, %v397_v11  ;;  %v577_v19 = vpop.f32.mrf.mxu1 }
 0x160   :  { %v523_v18 = vadd.f32 %v522_v14, %v460_v12 }
 0x162   :  { %v574_v17 = vadd.f32 %v573_v8, %v523_v18 }
 0x163   :  { %v401_v24 = vpop.f32.mrf.mxu2 }
 0x164   :  { %596 = vst.msk [vmem:[#allocation3 + $0x18] sm:$0xff] %vm592_vm2, %v574_v17  ;;  %v402_v26 = vadd.f32 %v401_v24, %v344_v13  ;;  %v471_v31 = vpop.f32.mrf.mxu3 }
 0x165   :  { %v526_v27 = vpop.f32.mrf.mxu0 }
 0x166   :  { %v466_v28 = vadd.f32 %v465_v15, %v402_v26  ;;  %v581_v35 = vpop.f32.mrf.mxu1 }
 0x168   :  { %v527_v29 = vadd.f32 %v526_v27, %v466_v28 }
 0x16a   :  { %v578_v16 = vadd.f32 %v577_v19, %v527_v29 }
 0x16b   :  { %v406_v33 = vpop.f32.mrf.mxu2 }
 0x16c   :  { %597 = vst.msk [vmem:[#allocation3 + $0x20] sm:$0xff] %vm592_vm2, %v578_v16  ;;  %v407_v30 = vadd.f32 %v406_v33, %v348_v32  ;;  %v477_v43 = vpop.f32.mrf.mxu3 }
 0x16d   :  { %v530_v36 = vpop.f32.mrf.mxu0 }
 0x16e   :  { %v472_v39 = vadd.f32 %v471_v31, %v407_v30  ;;  %v585_v37 = vpop.f32.mrf.mxu1 }
 0x170   :  { %v531_v34 = vadd.f32 %v530_v36, %v472_v39 }
 0x172   :  { %v582_v40 = vadd.f32 %v581_v35, %v531_v34 }
 0x173   :  { %v411_v44 = vpop.f32.mrf.mxu2 }
 0x174   :  { %598 = vst.msk [vmem:[#allocation3 + $0x28] sm:$0xff] %vm592_vm2, %v582_v40  ;;  %v412_v46 = vadd.f32 %v411_v44, %v352_v20  ;;  %v483_v52 = vpop.f32.mrf.mxu3 }
 0x175   :  { %v534_v47 = vpop.f32.mrf.mxu0 }
 0x176   :  { %v478_v25 = vadd.f32 %v477_v43, %v412_v46  ;;  %v589_v54 = vpop.f32.mrf.mxu1 }
 0x178   :  { %v535_v48 = vadd.f32 %v534_v47, %v478_v25 }
 0x17a   :  { %v586_v21 = vadd.f32 %v585_v37, %v535_v48 }
 0x17b   :  { %v416_v50 = vpop.f32.mrf.mxu2 }
 0x17c   :  { %599 = vst.msk [vmem:[#allocation3 + $0x30] sm:$0xff] %vm592_vm2, %v586_v21  ;;  %v417_v51 = vadd.f32 %v416_v50, %v356_v49 }
 0x17d   :  { %v538_v41 = vpop.f32.mrf.mxu0 }
 0x17e   :  { %v484_v38 = vadd.f32 %v483_v52, %v417_v51 }
 0x180   :  { %v539_v53 = vadd.f32 %v538_v41, %v484_v38 }
 0x182   :  { %v590_v22 = vadd.f32 %v589_v54, %v539_v53 }
 0x184   :  { %600 = vst.msk [vmem:[#allocation3 + $0x38] sm:$0xff] %vm592_vm2, %v590_v22 }
 0x185   :  { %613 = dma.vmem_to_hbm [thread:$0]  %s606_s29, 1024, %s608_s4, [#allocation4], %s655_s5, %s655_s5, %s656_s6  }
 0x186   :  { %651 = dma.done.wait [#allocation4], 1024  }
 0x187   :  { %652 = vsyncadd [#allocation4], 4294966272 }
 0x188   :  { %618 = vsyncpa [#allocation4], 1 }

</bundles_post_ra>
